<compile_context>
chip_gen: v7x
topology: tpu7x:2x2x1
jax: 0.10.0
libtpu: 0.0.40
codegen_flags: <defaults>
</compile_context>

<pallas_src>
import math

import jax
import jax.numpy as jnp
from jax.experimental import pallas as pl
from jax.experimental.pallas import tpu as pltpu


_LANE = 128                       # lane width (last dim granularity, f32)
_SUBLANE = 8                      # sublane granularity (second-to-last dim)
_TARGET_BLOCK_BYTES = 1 << 20     # aim for >= ~1 MiB of x per grid step
_VMEM_BUDGET_BYTES = 24 << 20     # tile budget: fits v7x 32 MiB scoped default
_VMEM_LIMIT_BYTES = 32 << 20      # raise v5e's 16 MiB scoped default


def _round_up(n, m):
    return ((n + m - 1) // m) * m


def _choose_tiles(B, HW, itemsize):
    """Pick (Bt, Tc): batch-block and flattened-(H*W)-block sizes."""

    def footprint(bt, tc):
        # 2x double-buffered x tiles + 2x double-buffered out tiles
        # + a (worst-case double-buffered) (1, tc) weights tile.
        return itemsize * (4 * bt * tc + 2 * tc)

    plane_bytes = HW * itemsize
    # Batch rows needed to reach the per-step payload target.
    bt = -(-_TARGET_BLOCK_BYTES // plane_bytes)          # ceil div
    if bt >= B or B <= _SUBLANE:
        bt = B                                           # whole batch, 1 step
    else:
        bt = min(B, _round_up(bt, _SUBLANE))             # (8,128)-rule: mult of 8

    if footprint(bt, HW) <= _VMEM_BUDGET_BYTES:
        return bt, HW

    # Too big: shrink the batch block (multiples of 8) before splitting a row,
    # so weights stay whole-row and lane-dense.
    if B > _SUBLANE:
        bt_max = (_VMEM_BUDGET_BYTES // itemsize - 2 * HW) // (4 * HW)
        bt_max = (bt_max // _SUBLANE) * _SUBLANE
        if bt_max >= _SUBLANE:
            return min(bt, bt_max), HW

    # Even a minimal batch slab is too big: also tile the flattened H*W axis.
    bt = B if B <= _SUBLANE else _SUBLANE
    tc = (_VMEM_BUDGET_BYTES // (itemsize * (4 * bt + 2))) // _LANE * _LANE
    return bt, max(_LANE, min(tc, HW))


def _hadamard_kernel(x_ref, w_ref, o_ref):
    # x_ref/o_ref: (Bt, Tc) tile; w_ref: (1, Tc) weights tile (broadcast over Bt).
    o_ref[...] = (x_ref[...] * w_ref[...]).astype(o_ref.dtype)


def hadamard_layer_pallas(x, weights, *, core_parallel=False):
    """out = x * weights.  x: (B, H, W), weights: (H, W).

    core_parallel=True shards the batch grid axis across TensorCores
    (useful on v7x with 2 TCs/chip); leave False on single-TC parts.
    """
    B, H, W = x.shape
    assert weights.shape == (H, W)
    HW = H * W
    itemsize = jnp.dtype(x.dtype).itemsize

    # Free, contiguous reshapes: present a single lane-dense last axis.
    x2 = x.reshape(B, HW)
    w2 = weights.reshape(1, HW)

    Bt, Tc = _choose_tiles(B, HW, itemsize)
    nb = pl.cdiv(B, Bt)
    nc = pl.cdiv(HW, Tc)

    # Weights: when the row is untiled the index map is constant, so the tile
    # stays VMEM-resident across the whole grid; single-buffer it when it is
    # large enough that the second pipeline buffer would cost real VMEM.
    if nc == 1:
        if HW * itemsize > (1 << 20):
            w_spec = pl.BlockSpec((1, Tc), lambda b, c: (0, 0),
                                  pipeline_mode=pl.Buffered(1))
        else:
            w_spec = pl.BlockSpec((1, Tc), lambda b, c: (0, 0))
    else:
        w_spec = pl.BlockSpec((1, Tc), lambda b, c: (0, c))

    batch_sem = pltpu.CORE_PARALLEL if core_parallel else pltpu.PARALLEL
    compiler_params = pltpu.CompilerParams(
        dimension_semantics=(batch_sem, pltpu.PARALLEL),
        vmem_limit_bytes=_VMEM_LIMIT_BYTES,
    )

    cost = pl.CostEstimate(
        flops=B * HW,
        transcendentals=0,
        bytes_accessed=(2 * B * HW + HW) * itemsize,
    )

    out2 = pl.pallas_call(
        _hadamard_kernel,
        out_shape=jax.ShapeDtypeStruct((B, HW), x.dtype),
        grid=(nb, nc),
        in_specs=[
            pl.BlockSpec((Bt, Tc), lambda b, c: (b, c)),
            w_spec,
        ],
        out_specs=pl.BlockSpec((Bt, Tc), lambda b, c: (b, c)),
        compiler_params=compiler_params,
        cost_estimate=cost,
    )(x2, w2)

    return out2.reshape(B, H, W)


def _reference(x, weights):
    """Pure-JAX reference mirroring the PyTorch forward."""
    return x * weights[None, :, :]


if __name__ == "__main__":
    # Module defaults: H=101, W=201.  Small batch of 2.
    batch, H, W = 2, 101, 201

    key = jax.random.PRNGKey(0)
    kx, kw, kb = jax.random.split(key, 3)

    x = jax.random.normal(kx, (batch, H, W), jnp.float32)

    # Kaiming-uniform-style init for the weights (values irrelevant to the
    # forward-pass check, but kept consistent with the module's init).
    fan_in = W
    gain = math.sqrt(2.0 / (1.0 + 5.0))          # a = sqrt(5)
    w_bound = gain * math.sqrt(3.0 / fan_in)
    weights = jax.random.uniform(kw, (H, W), jnp.float32,
                                 minval=-w_bound, maxval=w_bound)
    # TODO(synk): the module's `bias` parameter is initialized but never used
    # in forward(), so it is intentionally not part of the kernel.
    b_bound = 1.0 / math.sqrt(fan_in)
    _bias_unused = jax.random.uniform(kb, (H, W), jnp.float32,
                                      minval=-b_bound, maxval=b_bound)

    out = hadamard_layer_pallas(x, weights)
    jax.block_until_ready(out)

    ref = _reference(x, weights)
    assert out.shape == (batch, H, W)
    assert jnp.allclose(out, ref, atol=1e-6, rtol=1e-6)

    print("KERNEL_OK")
</pallas_src>

<mosaic_0001>
module attributes {stable_mosaic.version = 11 : i64} {
  func.func @_hadamard_kernel(%arg0: i32, %arg1: i32, %arg2: memref<2x20301xf32, #tpu.memory_space<vmem>>, %arg3: memref<1x20301xf32, #tpu.memory_space<vmem>>, %arg4: memref<2x20301xf32, #tpu.memory_space<vmem>>) attributes {dimension_semantics = [#tpu.dimension_semantics<parallel>, #tpu.dimension_semantics<parallel>], iteration_bounds = array<i64: 1, 1>, scalar_prefetch = 0 : i64, scratch_operands = 0 : i64, tpu.core_type = #tpu.core_type<tc>, window_params = [{transform_indices = @transform_0, window_bounds = array<i64: 2, 20301>}, {pipeline_mode = #tpu.pipeline_mode<synchronous>, transform_indices = @transform_1, window_bounds = array<i64: 1, 20301>}, {transform_indices = @transform_2, window_bounds = array<i64: 2, 20301>}]} {
    %c0 = arith.constant 0 : index
    %c0_0 = arith.constant 0 : index
    %0 = vector.load %arg2[%c0, %c0_0] : memref<2x20301xf32, #tpu.memory_space<vmem>>, vector<2x20301xf32>
    %c0_1 = arith.constant 0 : index
    %c0_2 = arith.constant 0 : index
    %1 = vector.load %arg3[%c0_1, %c0_2] : memref<1x20301xf32, #tpu.memory_space<vmem>>, vector<1x20301xf32>
    %2 = vector.broadcast %1 : vector<1x20301xf32> to vector<2x20301xf32>
    %3 = arith.mulf %0, %2 : vector<2x20301xf32>
    %c0_3 = arith.constant 0 : index
    %c0_4 = arith.constant 0 : index
    %4 = vector.load %arg4[%c0_3, %c0_4] : memref<2x20301xf32, #tpu.memory_space<vmem>>, vector<2x20301xf32>
    tpu.vector_store %arg4[%c0_3, %c0_4], %3 {strides = array<i32>} : memref<2x20301xf32, #tpu.memory_space<vmem>>, vector<2x20301xf32>,
    return
  }
  func.func @transform_0(%arg0: i32, %arg1: i32) -> (i32, i32) {
    %c0_i32 = arith.constant 0 : i32
    return %arg0, %arg1 : i32, i32
  }
  func.func @transform_1(%arg0: i32, %arg1: i32) -> (i32, i32) {
    %c0_i32 = arith.constant 0 : i32
    %c0_i32_0 = arith.constant 0 : i32
    %c0_i32_1 = arith.constant 0 : i32
    return %c0_i32, %c0_i32_0 : i32, i32
  }
  func.func @transform_2(%arg0: i32, %arg1: i32) -> (i32, i32) {
    %c0_i32 = arith.constant 0 : i32
    return %arg0, %arg1 : i32, i32
  }
}

</mosaic_0001>

<bundles_post_ra>
// kernel: tpu_custom_call.1
= control target key start
LH: loop header
LB: loop body
LE: loop exit
PB: predicated region body
PF: predicated region fallthrough
CT: control target
= control target key end

     0   :  { %7 = vsyncpa [#allocation3], 0  ;;  %s1960_s0 = inlined_call_operand.hbm [shape: f32[2,20301], index: 0, kind: input, shape index: {}]   ;;  %s1961_s1 = inlined_call_operand.hbm [shape: f32[1,20301], index: 1, kind: input, shape index: {}]   ;;  %s1962_s2 = inlined_call_operand.hbm [shape: f32[2,20301], index: 2, kind: output, shape index: {}]  }
   0x1   :  { %8 = vsyncpa [#allocation6], 0 }
   0x2   :  { %9 = vsyncpa [#allocation4], 0  ;;  %s1648_s9 = smov [#allocation2]   ;;  %s1649_s11 = smov [#allocation5]  }
   0x3   :  { %s16_s10 = sshll.u32 %s1648_s9, 4  ;;  %s26_s12 = sshll.u32 %s1649_s11, 4  ;;  %s17_s10 = int_to_ptr.vmem [resolvable:$true] %s16_s10  ;;  %s27_s12 = int_to_ptr.vmem [resolvable:$true] %s26_s12 }
   0x4   :  { %s1576_s15 = scalar_lea.hbm %s1960_s0, 5088 }
   0x5   :  { %p1577_p0 = scmp.ne.s32.totalorder %s1960_s0, %s1576_s15  ;;  %p1580_p1 = scmp.lt.u32.totalorder %s1576_s15, %s1960_s0 }
   0x7   :  { %p1582_p2 = pnand %p1580_p1, %p1577_p0 }
   0x9   :  { %1585 = shalt.err (!%p1582_p2)
}
   0xa   :  { %s1586_s20 = scalar_lea.vmem %s17_s10, 5088  ;;  %p1591_p4 = scmp.lt.s32.totalorder %s17_s10, %s17_s10 }
   0xb   :  { %p1587_p3 = scmp.ne.s32.totalorder %s17_s10, %s1586_s20  ;;  %p1592_p5 = scmp.lt.s32.totalorder %s1586_s20, %s1586_s20 }
   0xd   :  { %p1593_p6 = por %p1592_p5, %p1591_p4 }
   0xf   :  { %p1594_p7 = pnand %p1593_p6, %p1587_p3 }
  0x11   :  { %1597 = shalt.err (!%p1594_p7)
}
  0x12   :  { %19 = dma.hbm_to_vmem [thread:$0]  %s1960_s0, 5088, %s17_s10, [#allocation3]  }
  0x13   :  { %s1598_s25 = scalar_lea.hbm %s1961_s1, 2544 }
  0x14   :  { %p1599_p8 = scmp.ne.s32.totalorder %s1961_s1, %s1598_s25  ;;  %p1602_p9 = scmp.lt.u32.totalorder %s1598_s25, %s1961_s1 }
  0x16   :  { %p1604_p10 = pnand %p1602_p9, %p1599_p8 }
  0x18   :  { %1607 = shalt.err (!%p1604_p10)
}
  0x19   :  { %s1608_s30 = scalar_lea.vmem %s27_s12, 2544  ;;  %s1612_s3 = scalar_lea.vmem %s27_s12, 2560 }
  0x1a   :  { %p1609_p11 = scmp.ne.s32.totalorder %s27_s12, %s1608_s30  ;;  %p1613_p12 = scmp.lt.s32.totalorder %s27_s12, %s27_s12 }
  0x1b   :  { %p1614_p13 = scmp.lt.s32.totalorder %s1612_s3, %s1608_s30 }
  0x1d   :  { %p1615_p0 = por %p1614_p13, %p1613_p12 }
  0x1f   :  { %p1616_p1 = pnand %p1615_p0, %p1609_p11 }
  0x21   :  { %1619 = shalt.err (!%p1616_p1)
}
  0x22   :  { %29 = dma.hbm_to_vmem [thread:$0]  %s1961_s1, 2544, %s27_s12, [#allocation6]  }
  0x23   :  { %1642 = dma.done.wait [#allocation3], 5088  }
  0x24   :  { %1643 = vsyncadd [#allocation3], 4294962208 }
  0x25   :  { %1644 = dma.done.wait [#allocation6], 2544  }
  0x26   :  { %1645 = vsyncadd [#allocation6], 4294964752  ;;  %v116_v0 = vlaneseq  ;;  %v1650_v1 = vmov 1983009808   ;;  %v76_v13 = vld [vmem:[#allocation5] sm:$0xff]  ;;  %v77_v19 = vld [vmem:[#allocation5 + $0x8] sm:$0xff] }
  0x27   :  { %v755_v2 = vunpack.c.l.s4 %v1650_v1  ;;  %v78_v36 = vld [vmem:[#allocation5 + $0x10] sm:$0xff]  ;;  %v36_v37 = vld [vmem:[#allocation2] sm:$0xff]  ;;  %v79_v60 = vld [vmem:[#allocation5 + $0x18] sm:$0xff]  ;;  %vm1550_vm0 = vcmask 1041408   ;;  %vm1551_vm1 = vcmask 1043458   ;;  %vm1553_vm3 = vcmask 627716  }
  0x28   :  { %v117_v3 = vshrl.u32 %v116_v0, 7  ;;  %v37_v43 = vld [vmem:[#allocation2 + $0x8] sm:$0xff]  ;;  %v38_v52 = vld [vmem:[#allocation2 + $0x10] sm:$0xff]  ;;  %vm1552_vm2 = vmor %vm1551_vm1, %vm1550_vm0  ;;  %s1651_s1 = smov [#allocation7]  }
  0x29   :  { %v756_v4 = vunpack.c.0.s8 %v755_v2  ;;  %v39_v2 = vld [vmem:[#allocation2 + $0x18] sm:$0xff]  ;;  %s1562_s5 = sshll.u32 %s1651_s1, 4  ;;  %vm1554_vm4 = vmor %vm1553_vm3, %vm1552_vm2  ;;  %s1563_s5 = int_to_ptr.vmem [resolvable:$true] %s1562_s5 }
  0x2a   :  { %v1691_v5 = vsub.s32 0, %v117_v3  ;;  %v1693_v6 = vsub.s32 1, %v117_v3  ;;  %v1695_v7 = vsub.s32 2, %v117_v3  ;;  %v1697_v8 = vsub.s32 3, %v117_v3  ;;  %s1620_s6 = scalar_lea.vmem %s1563_s5, 5088  ;;  %p1625_p3 = scmp.lt.s32.totalorder %s1563_s5, %s1563_s5 }
  0x2b   :  { %v1699_v9 = vsub.s32 4, %v117_v3  ;;  %v1701_v10 = vsub.s32 5, %v117_v3  ;;  %v1703_v11 = vsub.s32 6, %v117_v3  ;;  %v1705_v12 = vsub.s32 7, %v117_v3  ;;  %p1621_p2 = scmp.ne.s32.totalorder %s1563_s5, %s1620_s6  ;;  %p1626_p4 = scmp.lt.s32.totalorder %s1620_s6, %s1620_s6 }
  0x2c   :  { %v1707_v14 = vsub.s32 %v756_v4, %v117_v3  ;;  %v119_v15 = vrot.slane %v76_v13, %v1691_v5  ;;  %v123_v16 = vrot.slane %v76_v13, %v1693_v6  ;;  %v127_v17 = vrot.slane %v76_v13, %v1695_v7 }
  0x2d   :  { %v131_v18 = vrot.slane %v76_v13, %v1697_v8  ;;  %v135_v20 = vrot.slane %v76_v13, %v1699_v9  ;;  %v139_v21 = vrot.slane %v76_v13, %v1701_v10  ;;  %v143_v22 = vrot.slane %v76_v13, %v1703_v11  ;;  %p1627_p5 = por %p1626_p4, %p1625_p3 }
  0x2e   :  { %v147_v23 = vrot.slane %v76_v13, %v1705_v12  ;;  %v752_v24 = vcombine.low %v119_v15, %v123_v16  ;;  %v151_v26 = vrot.slane %v77_v19, %v1691_v5  ;;  %v155_v27 = vrot.slane %v77_v19, %v1693_v6 }
  0x2f   :  { %v753_v25 = vcombine.low %v127_v17, %v131_v18  ;;  %v769_v28 = vcombine.low %v135_v20, %v139_v21  ;;  %v159_v30 = vrot.slane %v77_v19, %v1695_v7  ;;  %v163_v31 = vrot.slane %v77_v19, %v1697_v8  ;;  %p1628_p6 = pnand %p1627_p5, %p1621_p2 }
  0x30   :  { %v770_v29 = vcombine.low %v143_v22, %v147_v23  ;;  %v760_v32 = vrot.slane %v752_v24, %v1707_v14  ;;  %v786_v34 = vcombine.low %v151_v26, %v155_v27  ;;  %v167_v35 = vrot.slane %v77_v19, %v1699_v9  ;;  %v80_v23 = vld [vmem:[#allocation5 + $0x20] sm:$0xff] }
  0x31   :  { %v767_v33 = vrot.slane %v753_v25, %v1707_v14  ;;  %v777_v38 = vrot.slane %v769_v28, %v1707_v14  ;;  %v787_v40 = vcombine.low %v159_v30, %v163_v31  ;;  %v171_v41 = vrot.slane %v77_v19, %v1701_v10  ;;  %v40_v25 = vld [vmem:[#allocation2 + $0x20] sm:$0xff] }
  0x32   :  { %v784_v39 = vrot.slane %v770_v29, %v1707_v14  ;;  %v794_v44 = vrot.slane %v786_v34, %v1707_v14  ;;  %v175_v45 = vrot.slane %v77_v19, %v1703_v11  ;;  %v179_v46 = vrot.slane %v77_v19, %v1705_v12 }
  0x33   :  { %v768_v42 = vcombine.low %v760_v32, %v767_v33  ;;  %v801_v48 = vrot.slane %v787_v40, %v1707_v14  ;;  %v803_v49 = vcombine.low %v167_v35, %v171_v41  ;;  %v183_v50 = vrot.slane %v78_v36, %v1691_v5  ;;  %v41_v33 = vld [vmem:[#allocation2 + $0x28] sm:$0xff] }
  0x34   :  { %v785_v47 = vcombine.low %v777_v38, %v784_v39  ;;  %v804_v53 = vcombine.low %v175_v45, %v179_v46  ;;  %v187_v54 = vrot.slane %v78_v36, %v1693_v6  ;;  %v191_v55 = vrot.slane %v78_v36, %v1695_v7  ;;  %v81_v46 = vld [vmem:[#allocation5 + $0x28] sm:$0xff] }
  0x35   :  { %v1471_v51 = vmul.f32 %v768_v42, %v36_v37  ;;  %v802_v57 = vcombine.low %v794_v44, %v801_v48  ;;  %v811_v58 = vrot.slane %v803_v49, %v1707_v14  ;;  %v195_v59 = vrot.slane %v78_v36, %v1697_v8  ;;  %v42_v48 = vld [vmem:[#allocation2 + $0x30] sm:$0xff] }
  0x36   :  { %v1472_v56 = vmul.f32 %v785_v47, %v37_v43  ;;  %v818_v61 = vrot.slane %v804_v53, %v1707_v14  ;;  %v820_v62 = vcombine.low %v183_v50, %v187_v54  ;;  %v199_v63 = vrot.slane %v78_v36, %v1699_v9 }
  0x37   :  { %1511 = vst [vmem:[#allocation7] sm:$0xff] %v1471_v51  ;;  %v203_v0 = vrot.slane %v78_v36, %v1701_v10  ;;  %v1473_v1 = vmul.f32 %v802_v57, %v38_v52  ;;  %v821_v3 = vcombine.low %v191_v55, %v195_v59  ;;  %v207_v4 = vrot.slane %v78_v36, %v1703_v11 }
  0x38   :  { %1512 = vst [vmem:[#allocation7 + $0x8] sm:$0xff] %v1472_v56  ;;  %v211_v13 = vrot.slane %v78_v36, %v1705_v12  ;;  %v819_v15 = vcombine.low %v811_v58, %v818_v61  ;;  %v828_v16 = vrot.slane %v820_v62, %v1707_v14  ;;  %v215_v18 = vrot.slane %v79_v60, %v1691_v5  ;;  %v43_v56 = vld [vmem:[#allocation2 + $0x38] sm:$0xff] }
  0x39   :  { %v837_v17 = vcombine.low %v199_v63, %v203_v0  ;;  %1513 = vst [vmem:[#allocation7 + $0x10] sm:$0xff] %v1473_v1  ;;  %v835_v19 = vrot.slane %v821_v3, %v1707_v14  ;;  %v219_v21 = vrot.slane %v79_v60, %v1693_v6  ;;  %v223_v22 = vrot.slane %v79_v60, %v1695_v7 }
  0x3a   :  { %v838_v20 = vcombine.low %v207_v4, %v211_v13  ;;  %v1474_v24 = vmul.f32 %v819_v15, %v39_v2  ;;  %v227_v27 = vrot.slane %v79_v60, %v1697_v8  ;;  %v231_v28 = vrot.slane %v79_v60, %v1699_v9  ;;  %v82_v13 = vld [vmem:[#allocation5 + $0x30] sm:$0xff] }
  0x3b   :  { %v845_v26 = vrot.slane %v837_v17, %v1707_v14  ;;  %v836_v29 = vcombine.low %v828_v16, %v835_v19  ;;  %v854_v31 = vcombine.low %v215_v18, %v219_v21  ;;  %v235_v32 = vrot.slane %v79_v60, %v1701_v10  ;;  %v44_v16 = vld [vmem:[#allocation2 + $0x40] sm:$0xff] }
  0x3c   :  { %v852_v30 = vrot.slane %v838_v20, %v1707_v14  ;;  %1514 = vst [vmem:[#allocation7 + $0x18] sm:$0xff] %v1474_v24  ;;  %v855_v34 = vcombine.low %v223_v22, %v227_v27  ;;  %v239_v35 = vrot.slane %v79_v60, %v1703_v11  ;;  %v243_v36 = vrot.slane %v79_v60, %v1705_v12  ;;  %v45_v24 = vld [vmem:[#allocation2 + $0x48] sm:$0xff] }
  0x3d   :  { %v247_v37 = vrot.slane %v80_v23, %v1691_v5  ;;  %v1475_v38 = vmul.f32 %v836_v29, %v40_v25  ;;  %v862_v40 = vrot.slane %v854_v31, %v1707_v14  ;;  %v871_v41 = vcombine.low %v231_v28, %v235_v32 }
  0x3e   :  { %v853_v39 = vcombine.low %v845_v26, %v852_v30  ;;  %v869_v42 = vrot.slane %v855_v34, %v1707_v14  ;;  %v872_v43 = vcombine.low %v239_v35, %v243_v36  ;;  %v251_v44 = vrot.slane %v80_v23, %v1693_v6 }
  0x3f   :  { %v255_v45 = vrot.slane %v80_v23, %v1695_v7  ;;  %1515 = vst [vmem:[#allocation7 + $0x20] sm:$0xff] %v1475_v38  ;;  %v879_v49 = vrot.slane %v871_v41, %v1707_v14  ;;  %v259_v50 = vrot.slane %v80_v23, %v1697_v8  ;;  %v263_v51 = vrot.slane %v80_v23, %v1699_v9 }
  0x40   :  { %v1476_v47 = vmul.f32 %v853_v39, %v41_v33  ;;  %v870_v52 = vcombine.low %v862_v40, %v869_v42  ;;  %v886_v53 = vrot.slane %v872_v43, %v1707_v14  ;;  %v888_v54 = vcombine.low %v247_v37, %v251_v44  ;;  %v83_v37 = vld [vmem:[#allocation5 + $0x38] sm:$0xff] }
  0x41   :  { %v267_v55 = vrot.slane %v80_v23, %v1701_v10  ;;  %v889_v57 = vcombine.low %v255_v45, %v259_v50  ;;  %v271_v58 = vrot.slane %v80_v23, %v1703_v11  ;;  %v275_v59 = vrot.slane %v80_v23, %v1705_v12  ;;  %v46_v39 = vld [vmem:[#allocation2 + $0x50] sm:$0xff] }
  0x42   :  { %1516 = vst [vmem:[#allocation7 + $0x28] sm:$0xff] %v1476_v47  ;;  %v279_v60 = vrot.slane %v81_v46, %v1691_v5  ;;  %v1477_v61 = vmul.f32 %v870_v52, %v42_v48  ;;  %v887_v62 = vcombine.low %v879_v49, %v886_v53  ;;  %v896_v63 = vrot.slane %v888_v54, %v1707_v14  ;;  %v47_v47 = vld [vmem:[#allocation2 + $0x58] sm:$0xff] }
  0x43   :  { %v905_v0 = vcombine.low %v263_v51, %v267_v55  ;;  %v903_v1 = vrot.slane %v889_v57, %v1707_v14  ;;  %v906_v2 = vcombine.low %v271_v58, %v275_v59  ;;  %v283_v3 = vrot.slane %v81_v46, %v1693_v6 }
  0x44   :  { %v287_v4 = vrot.slane %v81_v46, %v1695_v7  ;;  %1517 = vst [vmem:[#allocation7 + $0x30] sm:$0xff] %v1477_v61  ;;  %v1478_v15 = vmul.f32 %v887_v62, %v43_v56  ;;  %v291_v18 = vrot.slane %v81_v46, %v1697_v8  ;;  %v295_v19 = vrot.slane %v81_v46, %v1699_v9  ;;  %v48_v62 = vld [vmem:[#allocation2 + $0x60] sm:$0xff] }
  0x45   :  { %v913_v17 = vrot.slane %v905_v0, %v1707_v14  ;;  %v904_v20 = vcombine.low %v896_v63, %v903_v1  ;;  %v920_v21 = vrot.slane %v906_v2, %v1707_v14  ;;  %v922_v22 = vcombine.low %v279_v60, %v283_v3  ;;  %v84_v60 = vld [vmem:[#allocation5 + $0x40] sm:$0xff] }
  0x46   :  { %v299_v23 = vrot.slane %v81_v46, %v1701_v10  ;;  %1518 = vst [vmem:[#allocation7 + $0x38] sm:$0xff] %v1478_v15  ;;  %v923_v25 = vcombine.low %v287_v4, %v291_v18  ;;  %v303_v26 = vrot.slane %v81_v46, %v1703_v11  ;;  %v307_v27 = vrot.slane %v81_v46, %v1705_v12  ;;  %v49_v15 = vld [vmem:[#allocation2 + $0x68] sm:$0xff] }
  0x47   :  { %v311_v28 = vrot.slane %v82_v13, %v1691_v5  ;;  %v1479_v29 = vmul.f32 %v904_v20, %v44_v16  ;;  %v921_v30 = vcombine.low %v913_v17, %v920_v21  ;;  %v930_v31 = vrot.slane %v922_v22, %v1707_v14 }
  0x48   :  { %v939_v32 = vcombine.low %v295_v19, %v299_v23  ;;  %v937_v33 = vrot.slane %v923_v25, %v1707_v14  ;;  %v940_v34 = vcombine.low %v303_v26, %v307_v27  ;;  %v315_v35 = vrot.slane %v82_v13, %v1693_v6 }
  0x49   :  { %v319_v36 = vrot.slane %v82_v13, %v1695_v7  ;;  %1519 = vst [vmem:[#allocation7 + $0x40] sm:$0xff] %v1479_v29  ;;  %v1480_v38 = vmul.f32 %v921_v30, %v45_v24  ;;  %v323_v41 = vrot.slane %v82_v13, %v1697_v8  ;;  %v327_v42 = vrot.slane %v82_v13, %v1699_v9  ;;  %v50_v30 = vld [vmem:[#allocation2 + $0x70] sm:$0xff] }
  0x4a   :  { %v947_v40 = vrot.slane %v939_v32, %v1707_v14  ;;  %v938_v43 = vcombine.low %v930_v31, %v937_v33  ;;  %v954_v44 = vrot.slane %v940_v34, %v1707_v14  ;;  %v956_v45 = vcombine.low %v311_v28, %v315_v35  ;;  %v85_v28 = vld [vmem:[#allocation5 + $0x48] sm:$0xff] }
  0x4b   :  { %v331_v46 = vrot.slane %v82_v13, %v1701_v10  ;;  %1520 = vst [vmem:[#allocation7 + $0x48] sm:$0xff] %v1480_v38  ;;  %v957_v48 = vcombine.low %v319_v36, %v323_v41  ;;  %v335_v49 = vrot.slane %v82_v13, %v1703_v11  ;;  %v339_v50 = vrot.slane %v82_v13, %v1705_v12  ;;  %v51_v38 = vld [vmem:[#allocation2 + $0x78] sm:$0xff] }
  0x4c   :  { %v343_v51 = vrot.slane %v83_v37, %v1691_v5  ;;  %v1481_v52 = vmul.f32 %v938_v43, %v46_v39  ;;  %v955_v53 = vcombine.low %v947_v40, %v954_v44  ;;  %v964_v54 = vrot.slane %v956_v45, %v1707_v14 }
  0x4d   :  { %v973_v55 = vcombine.low %v327_v42, %v331_v46  ;;  %v971_v56 = vrot.slane %v957_v48, %v1707_v14  ;;  %v974_v57 = vcombine.low %v335_v49, %v339_v50  ;;  %v347_v58 = vrot.slane %v83_v37, %v1693_v6 }
  0x4e   :  { %v351_v59 = vrot.slane %v83_v37, %v1695_v7  ;;  %1521 = vst [vmem:[#allocation7 + $0x50] sm:$0xff] %v1481_v52  ;;  %v1482_v61 = vmul.f32 %v955_v53, %v47_v47  ;;  %v355_v0 = vrot.slane %v83_v37, %v1697_v8  ;;  %v359_v1 = vrot.slane %v83_v37, %v1699_v9  ;;  %v52_v53 = vld [vmem:[#allocation2 + $0x80] sm:$0xff] }
  0x4f   :  { %v981_v63 = vrot.slane %v973_v55, %v1707_v14  ;;  %v972_v2 = vcombine.low %v964_v54, %v971_v56  ;;  %v988_v3 = vrot.slane %v974_v57, %v1707_v14  ;;  %v990_v4 = vcombine.low %v343_v51, %v347_v58  ;;  %v86_v51 = vld [vmem:[#allocation5 + $0x50] sm:$0xff] }
  0x50   :  { %v363_v13 = vrot.slane %v83_v37, %v1701_v10  ;;  %1522 = vst [vmem:[#allocation7 + $0x58] sm:$0xff] %v1482_v61  ;;  %v991_v16 = vcombine.low %v351_v59, %v355_v0  ;;  %v367_v17 = vrot.slane %v83_v37, %v1703_v11  ;;  %v371_v18 = vrot.slane %v83_v37, %v1705_v12  ;;  %v53_v61 = vld [vmem:[#allocation2 + $0x88] sm:$0xff] }
  0x51   :  { %v375_v19 = vrot.slane %v84_v60, %v1691_v5  ;;  %v1483_v20 = vmul.f32 %v972_v2, %v48_v62  ;;  %v989_v21 = vcombine.low %v981_v63, %v988_v3  ;;  %v998_v22 = vrot.slane %v990_v4, %v1707_v14 }
  0x52   :  { %v1007_v23 = vcombine.low %v359_v1, %v363_v13  ;;  %v1005_v24 = vrot.slane %v991_v16, %v1707_v14  ;;  %v1008_v25 = vcombine.low %v367_v17, %v371_v18  ;;  %v379_v26 = vrot.slane %v84_v60, %v1693_v6 }
  0x53   :  { %v383_v27 = vrot.slane %v84_v60, %v1695_v7  ;;  %1523 = vst [vmem:[#allocation7 + $0x60] sm:$0xff] %v1483_v20  ;;  %v1484_v29 = vmul.f32 %v989_v21, %v49_v15  ;;  %v387_v32 = vrot.slane %v84_v60, %v1697_v8  ;;  %v391_v33 = vrot.slane %v84_v60, %v1699_v9  ;;  %v54_v21 = vld [vmem:[#allocation2 + $0x90] sm:$0xff] }
  0x54   :  { %v1015_v31 = vrot.slane %v1007_v23, %v1707_v14  ;;  %v1006_v34 = vcombine.low %v998_v22, %v1005_v24  ;;  %v1022_v35 = vrot.slane %v1008_v25, %v1707_v14  ;;  %v1024_v36 = vcombine.low %v375_v19, %v379_v26  ;;  %v87_v19 = vld [vmem:[#allocation5 + $0x58] sm:$0xff] }
  0x55   :  { %v395_v37 = vrot.slane %v84_v60, %v1701_v10  ;;  %1524 = vst [vmem:[#allocation7 + $0x68] sm:$0xff] %v1484_v29  ;;  %v1025_v39 = vcombine.low %v383_v27, %v387_v32  ;;  %v399_v40 = vrot.slane %v84_v60, %v1703_v11  ;;  %v403_v41 = vrot.slane %v84_v60, %v1705_v12  ;;  %v55_v29 = vld [vmem:[#allocation2 + $0x98] sm:$0xff] }
  0x56   :  { %v407_v42 = vrot.slane %v85_v28, %v1691_v5  ;;  %v1485_v43 = vmul.f32 %v1006_v34, %v50_v30  ;;  %v1023_v44 = vcombine.low %v1015_v31, %v1022_v35  ;;  %v1032_v45 = vrot.slane %v1024_v36, %v1707_v14 }
  0x57   :  { %v1041_v46 = vcombine.low %v391_v33, %v395_v37  ;;  %v1039_v47 = vrot.slane %v1025_v39, %v1707_v14  ;;  %v1042_v48 = vcombine.low %v399_v40, %v403_v41  ;;  %v411_v49 = vrot.slane %v85_v28, %v1693_v6 }
  0x58   :  { %v415_v50 = vrot.slane %v85_v28, %v1695_v7  ;;  %1525 = vst [vmem:[#allocation7 + $0x70] sm:$0xff] %v1485_v43  ;;  %v1486_v52 = vmul.f32 %v1023_v44, %v51_v38  ;;  %v419_v55 = vrot.slane %v85_v28, %v1697_v8  ;;  %v423_v56 = vrot.slane %v85_v28, %v1699_v9  ;;  %v56_v44 = vld [vmem:[#allocation2 + $0xa0] sm:$0xff] }
  0x59   :  { %v1049_v54 = vrot.slane %v1041_v46, %v1707_v14  ;;  %v1040_v57 = vcombine.low %v1032_v45, %v1039_v47  ;;  %v1056_v58 = vrot.slane %v1042_v48, %v1707_v14  ;;  %v1058_v59 = vcombine.low %v407_v42, %v411_v49  ;;  %v88_v42 = vld [vmem:[#allocation5 + $0x60] sm:$0xff] }
  0x5a   :  { %v427_v60 = vrot.slane %v85_v28, %v1701_v10  ;;  %1526 = vst [vmem:[#allocation7 + $0x78] sm:$0xff] %v1486_v52  ;;  %v1059_v62 = vcombine.low %v415_v50, %v419_v55  ;;  %v431_v63 = vrot.slane %v85_v28, %v1703_v11  ;;  %v435_v0 = vrot.slane %v85_v28, %v1705_v12  ;;  %v57_v52 = vld [vmem:[#allocation2 + $0xa8] sm:$0xff] }
  0x5b   :  { %v439_v1 = vrot.slane %v86_v51, %v1691_v5  ;;  %v1487_v2 = vmul.f32 %v1040_v57, %v52_v53  ;;  %v1057_v3 = vcombine.low %v1049_v54, %v1056_v58  ;;  %v1066_v4 = vrot.slane %v1058_v59, %v1707_v14 }
  0x5c   :  { %v1075_v13 = vcombine.low %v423_v56, %v427_v60  ;;  %v1073_v15 = vrot.slane %v1059_v62, %v1707_v14  ;;  %v1076_v16 = vcombine.low %v431_v63, %v435_v0  ;;  %v443_v17 = vrot.slane %v86_v51, %v1693_v6 }
  0x5d   :  { %v447_v18 = vrot.slane %v86_v51, %v1695_v7  ;;  %1527 = vst [vmem:[#allocation7 + $0x80] sm:$0xff] %v1487_v2  ;;  %v1488_v20 = vmul.f32 %v1057_v3, %v53_v61  ;;  %v451_v23 = vrot.slane %v86_v51, %v1697_v8  ;;  %v455_v24 = vrot.slane %v86_v51, %v1699_v9  ;;  %v58_v3 = vld [vmem:[#allocation2 + $0xb0] sm:$0xff] }
  0x5e   :  { %v1083_v22 = vrot.slane %v1075_v13, %v1707_v14  ;;  %v1074_v25 = vcombine.low %v1066_v4, %v1073_v15  ;;  %v1090_v26 = vrot.slane %v1076_v16, %v1707_v14  ;;  %v1092_v27 = vcombine.low %v439_v1, %v443_v17  ;;  %v89_v1 = vld [vmem:[#allocation5 + $0x68] sm:$0xff] }
  0x5f   :  { %v459_v28 = vrot.slane %v86_v51, %v1701_v10  ;;  %1528 = vst [vmem:[#allocation7 + $0x88] sm:$0xff] %v1488_v20  ;;  %v1093_v30 = vcombine.low %v447_v18, %v451_v23  ;;  %v463_v31 = vrot.slane %v86_v51, %v1703_v11  ;;  %v467_v32 = vrot.slane %v86_v51, %v1705_v12  ;;  %v59_v20 = vld [vmem:[#allocation2 + $0xb8] sm:$0xff] }
  0x60   :  { %v471_v33 = vrot.slane %v87_v19, %v1691_v5  ;;  %v1489_v34 = vmul.f32 %v1074_v25, %v54_v21  ;;  %v1091_v35 = vcombine.low %v1083_v22, %v1090_v26  ;;  %v1100_v36 = vrot.slane %v1092_v27, %v1707_v14 }
  0x61   :  { %v1109_v37 = vcombine.low %v455_v24, %v459_v28  ;;  %v1107_v38 = vrot.slane %v1093_v30, %v1707_v14  ;;  %v1110_v39 = vcombine.low %v463_v31, %v467_v32  ;;  %v475_v40 = vrot.slane %v87_v19, %v1693_v6 }
  0x62   :  { %v479_v41 = vrot.slane %v87_v19, %v1695_v7  ;;  %1529 = vst [vmem:[#allocation7 + $0x90] sm:$0xff] %v1489_v34  ;;  %v1490_v43 = vmul.f32 %v1091_v35, %v55_v29  ;;  %v483_v46 = vrot.slane %v87_v19, %v1697_v8  ;;  %v487_v47 = vrot.slane %v87_v19, %v1699_v9  ;;  %v60_v35 = vld [vmem:[#allocation2 + $0xc0] sm:$0xff] }
  0x63   :  { %v1117_v45 = vrot.slane %v1109_v37, %v1707_v14  ;;  %v1108_v48 = vcombine.low %v1100_v36, %v1107_v38  ;;  %v1124_v49 = vrot.slane %v1110_v39, %v1707_v14  ;;  %v1126_v50 = vcombine.low %v471_v33, %v475_v40  ;;  %v90_v33 = vld [vmem:[#allocation5 + $0x70] sm:$0xff] }
  0x64   :  { %v491_v51 = vrot.slane %v87_v19, %v1701_v10  ;;  %1530 = vst [vmem:[#allocation7 + $0x98] sm:$0xff] %v1490_v43  ;;  %v1127_v53 = vcombine.low %v479_v41, %v483_v46  ;;  %v495_v54 = vrot.slane %v87_v19, %v1703_v11  ;;  %v499_v55 = vrot.slane %v87_v19, %v1705_v12  ;;  %v61_v43 = vld [vmem:[#allocation2 + $0xc8] sm:$0xff] }
  0x65   :  { %v503_v56 = vrot.slane %v88_v42, %v1691_v5  ;;  %v1491_v57 = vmul.f32 %v1108_v48, %v56_v44  ;;  %v1125_v58 = vcombine.low %v1117_v45, %v1124_v49  ;;  %v1134_v59 = vrot.slane %v1126_v50, %v1707_v14 }
  0x66   :  { %v1143_v60 = vcombine.low %v487_v47, %v491_v51  ;;  %v1141_v61 = vrot.slane %v1127_v53, %v1707_v14  ;;  %v1144_v62 = vcombine.low %v495_v54, %v499_v55  ;;  %v507_v63 = vrot.slane %v88_v42, %v1693_v6 }
  0x67   :  { %v511_v0 = vrot.slane %v88_v42, %v1695_v7  ;;  %1531 = vst [vmem:[#allocation7 + $0xa0] sm:$0xff] %v1491_v57  ;;  %v1492_v2 = vmul.f32 %v1125_v58, %v57_v52  ;;  %v515_v13 = vrot.slane %v88_v42, %v1697_v8  ;;  %v519_v15 = vrot.slane %v88_v42, %v1699_v9  ;;  %v62_v58 = vld [vmem:[#allocation2 + $0xd0] sm:$0xff] }
  0x68   :  { %v1151_v4 = vrot.slane %v1143_v60, %v1707_v14  ;;  %v1142_v16 = vcombine.low %v1134_v59, %v1141_v61  ;;  %v1158_v17 = vrot.slane %v1144_v62, %v1707_v14  ;;  %v1160_v18 = vcombine.low %v503_v56, %v507_v63  ;;  %v91_v56 = vld [vmem:[#allocation5 + $0x78] sm:$0xff] }
  0x69   :  { %v523_v19 = vrot.slane %v88_v42, %v1701_v10  ;;  %1532 = vst [vmem:[#allocation7 + $0xa8] sm:$0xff] %v1492_v2  ;;  %v1161_v21 = vcombine.low %v511_v0, %v515_v13  ;;  %v527_v22 = vrot.slane %v88_v42, %v1703_v11  ;;  %v531_v23 = vrot.slane %v88_v42, %v1705_v12  ;;  %v63_v2 = vld [vmem:[#allocation2 + $0xd8] sm:$0xff] }
  0x6a   :  { %v535_v24 = vrot.slane %v89_v1, %v1691_v5  ;;  %v1493_v25 = vmul.f32 %v1142_v16, %v58_v3  ;;  %v1159_v26 = vcombine.low %v1151_v4, %v1158_v17  ;;  %v1168_v27 = vrot.slane %v1160_v18, %v1707_v14 }
  0x6b   :  { %v1177_v28 = vcombine.low %v519_v15, %v523_v19  ;;  %v1175_v29 = vrot.slane %v1161_v21, %v1707_v14  ;;  %v1178_v30 = vcombine.low %v527_v22, %v531_v23  ;;  %v539_v31 = vrot.slane %v89_v1, %v1693_v6 }
  0x6c   :  { %v543_v32 = vrot.slane %v89_v1, %v1695_v7  ;;  %1533 = vst [vmem:[#allocation7 + $0xb0] sm:$0xff] %v1493_v25  ;;  %v1494_v34 = vmul.f32 %v1159_v26, %v59_v20  ;;  %v547_v37 = vrot.slane %v89_v1, %v1697_v8  ;;  %v551_v38 = vrot.slane %v89_v1, %v1699_v9  ;;  %v64_v26 = vld [vmem:[#allocation2 + $0xe0] sm:$0xff] }
  0x6d   :  { %v1185_v36 = vrot.slane %v1177_v28, %v1707_v14  ;;  %v1176_v39 = vcombine.low %v1168_v27, %v1175_v29  ;;  %v1192_v40 = vrot.slane %v1178_v30, %v1707_v14  ;;  %v1194_v41 = vcombine.low %v535_v24, %v539_v31  ;;  %v92_v24 = vld [vmem:[#allocation5 + $0x80] sm:$0xff] }
  0x6e   :  { %v555_v42 = vrot.slane %v89_v1, %v1701_v10  ;;  %1534 = vst [vmem:[#allocation7 + $0xb8] sm:$0xff] %v1494_v34  ;;  %v1195_v44 = vcombine.low %v543_v32, %v547_v37  ;;  %v559_v45 = vrot.slane %v89_v1, %v1703_v11  ;;  %v563_v46 = vrot.slane %v89_v1, %v1705_v12  ;;  %v65_v34 = vld [vmem:[#allocation2 + $0xe8] sm:$0xff] }
  0x6f   :  { %v567_v47 = vrot.slane %v90_v33, %v1691_v5  ;;  %v1495_v48 = vmul.f32 %v1176_v39, %v60_v35  ;;  %v1193_v49 = vcombine.low %v1185_v36, %v1192_v40  ;;  %v1202_v50 = vrot.slane %v1194_v41, %v1707_v14 }
  0x70   :  { %v1211_v51 = vcombine.low %v551_v38, %v555_v42  ;;  %v1209_v52 = vrot.slane %v1195_v44, %v1707_v14  ;;  %v1212_v53 = vcombine.low %v559_v45, %v563_v46  ;;  %v571_v54 = vrot.slane %v90_v33, %v1693_v6 }
  0x71   :  { %v575_v55 = vrot.slane %v90_v33, %v1695_v7  ;;  %1535 = vst [vmem:[#allocation7 + $0xc0] sm:$0xff] %v1495_v48  ;;  %v1496_v57 = vmul.f32 %v1193_v49, %v61_v43  ;;  %v579_v60 = vrot.slane %v90_v33, %v1697_v8  ;;  %v583_v61 = vrot.slane %v90_v33, %v1699_v9  ;;  %v66_v49 = vld [vmem:[#allocation2 + $0xf0] sm:$0xff] }
  0x72   :  { %v1219_v59 = vrot.slane %v1211_v51, %v1707_v14  ;;  %v1210_v62 = vcombine.low %v1202_v50, %v1209_v52  ;;  %v1226_v63 = vrot.slane %v1212_v53, %v1707_v14  ;;  %v1228_v0 = vcombine.low %v567_v47, %v571_v54  ;;  %v93_v47 = vld [vmem:[#allocation5 + $0x88] sm:$0xff] }
  0x73   :  { %v587_v1 = vrot.slane %v90_v33, %v1701_v10  ;;  %1536 = vst [vmem:[#allocation7 + $0xc8] sm:$0xff] %v1496_v57  ;;  %v1229_v3 = vcombine.low %v575_v55, %v579_v60  ;;  %v591_v4 = vrot.slane %v90_v33, %v1703_v11  ;;  %v595_v13 = vrot.slane %v90_v33, %v1705_v12  ;;  %v67_v57 = vld [vmem:[#allocation2 + $0xf8] sm:$0xff] }
  0x74   :  { %v599_v15 = vrot.slane %v91_v56, %v1691_v5  ;;  %v1497_v16 = vmul.f32 %v1210_v62, %v62_v58  ;;  %v1227_v17 = vcombine.low %v1219_v59, %v1226_v63  ;;  %v1236_v18 = vrot.slane %v1228_v0, %v1707_v14 }
  0x75   :  { %v1245_v19 = vcombine.low %v583_v61, %v587_v1  ;;  %v1243_v20 = vrot.slane %v1229_v3, %v1707_v14  ;;  %v1246_v21 = vcombine.low %v591_v4, %v595_v13  ;;  %v603_v22 = vrot.slane %v91_v56, %v1693_v6 }
  0x76   :  { %v607_v23 = vrot.slane %v91_v56, %v1695_v7  ;;  %1537 = vst [vmem:[#allocation7 + $0xd0] sm:$0xff] %v1497_v16  ;;  %v1498_v25 = vmul.f32 %v1227_v17, %v63_v2  ;;  %v611_v28 = vrot.slane %v91_v56, %v1697_v8  ;;  %v615_v29 = vrot.slane %v91_v56, %v1699_v9  ;;  %v68_v17 = vld [vmem:[#allocation2 + $0x100] sm:$0xff] }
  0x77   :  { %v1253_v27 = vrot.slane %v1245_v19, %v1707_v14  ;;  %v1244_v30 = vcombine.low %v1236_v18, %v1243_v20  ;;  %v1260_v31 = vrot.slane %v1246_v21, %v1707_v14  ;;  %v1262_v32 = vcombine.low %v599_v15, %v603_v22  ;;  %v94_v15 = vld [vmem:[#allocation5 + $0x90] sm:$0xff] }
  0x78   :  { %v619_v33 = vrot.slane %v91_v56, %v1701_v10  ;;  %1538 = vst [vmem:[#allocation7 + $0xd8] sm:$0xff] %v1498_v25  ;;  %v1263_v35 = vcombine.low %v607_v23, %v611_v28  ;;  %v623_v36 = vrot.slane %v91_v56, %v1703_v11  ;;  %v627_v37 = vrot.slane %v91_v56, %v1705_v12  ;;  %v69_v25 = vld [vmem:[#allocation2 + $0x108] sm:$0xff] }
  0x79   :  { %v631_v38 = vrot.slane %v92_v24, %v1691_v5  ;;  %v1499_v39 = vmul.f32 %v1244_v30, %v64_v26  ;;  %v1261_v40 = vcombine.low %v1253_v27, %v1260_v31  ;;  %v1270_v41 = vrot.slane %v1262_v32, %v1707_v14 }
  0x7a   :  { %v1279_v42 = vcombine.low %v615_v29, %v619_v33  ;;  %v1277_v43 = vrot.slane %v1263_v35, %v1707_v14  ;;  %v1280_v44 = vcombine.low %v623_v36, %v627_v37  ;;  %v635_v45 = vrot.slane %v92_v24, %v1693_v6 }
  0x7b   :  { %v639_v46 = vrot.slane %v92_v24, %v1695_v7  ;;  %1539 = vst [vmem:[#allocation7 + $0xe0] sm:$0xff] %v1499_v39  ;;  %v1500_v48 = vmul.f32 %v1261_v40, %v65_v34  ;;  %v643_v51 = vrot.slane %v92_v24, %v1697_v8  ;;  %v647_v52 = vrot.slane %v92_v24, %v1699_v9  ;;  %v70_v40 = vld [vmem:[#allocation2 + $0x110] sm:$0xff] }
  0x7c   :  { %v1287_v50 = vrot.slane %v1279_v42, %v1707_v14  ;;  %v1278_v53 = vcombine.low %v1270_v41, %v1277_v43  ;;  %v1294_v54 = vrot.slane %v1280_v44, %v1707_v14  ;;  %v1296_v55 = vcombine.low %v631_v38, %v635_v45  ;;  %v95_v38 = vld [vmem:[#allocation5 + $0x98] sm:$0x7f] }
  0x7d   :  { %v651_v56 = vrot.slane %v92_v24, %v1701_v10  ;;  %1540 = vst [vmem:[#allocation7 + $0xe8] sm:$0xff] %v1500_v48  ;;  %v1297_v58 = vcombine.low %v639_v46, %v643_v51  ;;  %v655_v59 = vrot.slane %v92_v24, %v1703_v11  ;;  %v659_v60 = vrot.slane %v92_v24, %v1705_v12  ;;  %v71_v48 = vld [vmem:[#allocation2 + $0x118] sm:$0xff] }
  0x7e   :  { %v663_v61 = vrot.slane %v93_v47, %v1691_v5  ;;  %v1501_v62 = vmul.f32 %v1278_v53, %v66_v49  ;;  %v1295_v63 = vcombine.low %v1287_v50, %v1294_v54  ;;  %v1304_v0 = vrot.slane %v1296_v55, %v1707_v14 }
  0x7f   :  { %v1313_v1 = vcombine.low %v647_v52, %v651_v56  ;;  %v1311_v2 = vrot.slane %v1297_v58, %v1707_v14  ;;  %v1314_v3 = vcombine.low %v655_v59, %v659_v60  ;;  %v667_v4 = vrot.slane %v93_v47, %v1693_v6 }
  0x80   :  { %v671_v13 = vrot.slane %v93_v47, %v1695_v7  ;;  %1541 = vst [vmem:[#allocation7 + $0xf0] sm:$0xff] %v1501_v62  ;;  %v1502_v16 = vmul.f32 %v1295_v63, %v67_v57  ;;  %v675_v19 = vrot.slane %v93_v47, %v1697_v8  ;;  %v679_v20 = vrot.slane %v93_v47, %v1699_v9  ;;  %v72_v62 = vld [vmem:[#allocation2 + $0x120] sm:$0xff] }
  0x81   :  { %v1321_v18 = vrot.slane %v1313_v1, %v1707_v14  ;;  %v1312_v21 = vcombine.low %v1304_v0, %v1311_v2  ;;  %v1328_v22 = vrot.slane %v1314_v3, %v1707_v14  ;;  %v1330_v23 = vcombine.low %v663_v61, %v667_v4  ;;  %v73_v4 = vld [vmem:[#allocation2 + $0x128] sm:$0xff] }
  0x82   :  { %v683_v24 = vrot.slane %v93_v47, %v1701_v10  ;;  %1542 = vst [vmem:[#allocation7 + $0xf8] sm:$0xff] %v1502_v16  ;;  %v1331_v26 = vcombine.low %v671_v13, %v675_v19  ;;  %v687_v27 = vrot.slane %v93_v47, %v1703_v11  ;;  %v691_v28 = vrot.slane %v93_v47, %v1705_v12  ;;  %v74_v19 = vld [vmem:[#allocation2 + $0x130] sm:$0xff] }
  0x83   :  { %v695_v29 = vrot.slane %v94_v15, %v1691_v5  ;;  %v1503_v30 = vmul.f32 %v1312_v21, %v68_v17  ;;  %v1329_v31 = vcombine.low %v1321_v18, %v1328_v22  ;;  %v1338_v32 = vrot.slane %v1330_v23, %v1707_v14 }
  0x84   :  { %v1347_v33 = vcombine.low %v679_v20, %v683_v24  ;;  %v1345_v34 = vrot.slane %v1331_v26, %v1707_v14  ;;  %v1348_v35 = vcombine.low %v687_v27, %v691_v28  ;;  %v699_v36 = vrot.slane %v94_v15, %v1693_v6 }
  0x85   :  { %v703_v37 = vrot.slane %v94_v15, %v1695_v7  ;;  %1543 = vst [vmem:[#allocation7 + $0x100] sm:$0xff] %v1503_v30  ;;  %v1504_v39 = vmul.f32 %v1329_v31, %v69_v25  ;;  %v707_v42 = vrot.slane %v94_v15, %v1697_v8  ;;  %v711_v43 = vrot.slane %v94_v15, %v1699_v9 }
  0x86   :  { %v1355_v41 = vrot.slane %v1347_v33, %v1707_v14  ;;  %v1346_v44 = vcombine.low %v1338_v32, %v1345_v34  ;;  %v1362_v45 = vrot.slane %v1348_v35, %v1707_v14  ;;  %v1364_v46 = vcombine.low %v695_v29, %v699_v36 }
  0x87   :  { %v715_v47 = vrot.slane %v94_v15, %v1701_v10  ;;  %1544 = vst [vmem:[#allocation7 + $0x108] sm:$0xff] %v1504_v39  ;;  %v1365_v49 = vcombine.low %v703_v37, %v707_v42  ;;  %v719_v50 = vrot.slane %v94_v15, %v1703_v11  ;;  %v723_v51 = vrot.slane %v94_v15, %v1705_v12 }
  0x88   :  { %v727_v52 = vrot.slane %v95_v38, %v1691_v5  ;;  %v1505_v53 = vmul.f32 %v1346_v44, %v70_v40  ;;  %v1363_v54 = vcombine.low %v1355_v41, %v1362_v45  ;;  %v1372_v55 = vrot.slane %v1364_v46, %v1707_v14 }
  0x89   :  { %v1381_v56 = vcombine.low %v711_v43, %v715_v47  ;;  %v1379_v57 = vrot.slane %v1365_v49, %v1707_v14  ;;  %v1382_v58 = vcombine.low %v719_v50, %v723_v51  ;;  %v731_v59 = vrot.slane %v95_v38, %v1693_v6 }
  0x8a   :  { %v735_v60 = vrot.slane %v95_v38, %v1695_v7  ;;  %1545 = vst [vmem:[#allocation7 + $0x110] sm:$0xff] %v1505_v53  ;;  %v1506_v61 = vmul.f32 %v1363_v54, %v71_v48  ;;  %v739_v12 = vrot.slane %v95_v38, %v1697_v8  ;;  %v743_v5 = vrot.slane %v95_v38, %v1699_v9 }
  0x8b   :  { %v1389_v63 = vrot.slane %v1381_v56, %v1707_v14  ;;  %v1380_v0 = vcombine.low %v1372_v55, %v1379_v57  ;;  %v1396_v1 = vrot.slane %v1382_v58, %v1707_v14  ;;  %v1398_v2 = vcombine.low %v727_v52, %v731_v59 }
  0x8c   :  { %v747_v3 = vrot.slane %v95_v38, %v1701_v10  ;;  %1546 = vst [vmem:[#allocation7 + $0x118] sm:$0xff] %v1506_v61  ;;  %v1399_v6 = vcombine.low %v735_v60, %v739_v12  ;;  %v751_v7 = vrot.slane %v95_v38, %v1703_v11  ;;  %v75_v11 = vld [vmem:[#allocation2 + $0x138] sm:$0x3f] }
  0x8d   :  { %v1507_v13 = vmul.f32 %v1380_v0, %v72_v62  ;;  %v1397_v15 = vcombine.low %v1389_v63, %v1396_v1  ;;  %v1406_v16 = vrot.slane %v1398_v2, %v1707_v14 }
  0x8e   :  { %v1415_v8 = vcombine.low %v743_v5, %v747_v3  ;;  %v1413_v9 = vrot.slane %v1399_v6, %v1707_v14  ;;  %v1429_v17 = vrot.slane %v751_v7, %v1707_v14 }
  0x8f   :  { %1547 = vst [vmem:[#allocation7 + $0x120] sm:$0xff] %v1507_v13  ;;  %v1508_v18 = vmul.f32 %v1397_v15, %v73_v4 }
  0x90   :  { %v1422_v10 = vrot.slane %v1415_v8, %v1707_v14  ;;  %v1414_v20 = vcombine.low %v1406_v16, %v1413_v9 }
  0x91   :  { %1548 = vst [vmem:[#allocation7 + $0x128] sm:$0xff] %v1508_v18 }
  0x92   :  { %v1430_v21 = vcombine.low %v1422_v10, %v1429_v17  ;;  %v1509_v22 = vmul.f32 %v1414_v20, %v74_v19 }
  0x94   :  { %v1510_v23 = vmul.f32 %v1430_v21, %v75_v11  ;;  %1549 = vst [vmem:[#allocation7 + $0x130] sm:$0xff] %v1509_v22 }
  0x96   :  { %1555 = vst.msk [vmem:[#allocation7 + $0x138] sm:$0x3f] %vm1554_vm4, %v1510_v23 }
  0x97   :  { %1631 = shalt.err (!%p1628_p6)
}
  0x98   :  { %s1632_s9 = scalar_lea.hbm %s1962_s2, 5088 }
  0x99   :  { %p1633_p7 = scmp.ne.s32.totalorder %s1962_s2, %s1632_s9  ;;  %p1636_p8 = scmp.lt.u32.totalorder %s1632_s9, %s1962_s2 }
  0x9b   :  { %p1638_p9 = pnand %p1636_p8, %p1633_p7 }
  0x9d   :  { %1641 = shalt.err (!%p1638_p9)
}
  0x9e   :  { %1565 = dma.vmem_to_hbm [thread:$0]  %s1563_s5, 5088, %s1962_s2, [#allocation4]  }
  0x9f   :  { %1646 = dma.done.wait [#allocation4], 5088  }
  0xa0   :  { %1647 = vsyncadd [#allocation4], 4294962208 }
  0xa1   :  { %1569 = vsyncpa [#allocation3], 1 }
  0xa2   :  { %1570 = vsyncpa [#allocation6], 1 }
  0xa3   :  { %1571 = vsyncpa [#allocation4], 1 }

</bundles_post_ra>
